<compile_context>
chip_gen: v5e
topology: v5e:2x2
jax: 0.10.0
libtpu: 0.0.40
codegen_flags: <defaults>
</compile_context>

<pallas_src>
import functools
import math

import jax
import jax.numpy as jnp
from jax.experimental import pallas as pl
from jax.experimental.pallas import tpu as pltpu


_VMEM_LIMIT = 48 * 1024 * 1024      # <= 48 MB: fits v7x (64 MiB VMEM) with headroom
_LINEAR_BUDGET = 32 * 1024 * 1024   # target double-buffered working set for linears


def _pick(dim, prefs):
    """Largest preferred tile size that evenly divides `dim` (else full dim)."""
    for p in prefs:
        if dim % p == 0:
            return p
    return dim


# ----------------------------------------------------------------------------
# Kernel 1: dense linear  y = x @ W^T + b   (c_attn and c_proj)
# Reduction axis collapsed (full K per tile) -> single MXU pass, no acc RMW.
# ----------------------------------------------------------------------------
def _linear_kernel(x_ref, w_ref, b_ref, o_ref):
    acc = jnp.dot(x_ref[...], w_ref[...], preferred_element_type=jnp.float32)
    o_ref[...] = (acc + b_ref[...].astype(jnp.float32)).astype(o_ref.dtype)


def _linear_tiles(M, K, N, in_isz, out_isz):
    tm = _pick(M, (512, 256, 128, 64, 32, 16, 8))
    cands = sorted({t for t in (N, 2048, 1024, 512, 256, 128)
                    if t <= N and N % t == 0}, reverse=True)
    for tn in cands:
        vmem = (2 * tm * K * in_isz       # x tile, double-buffered
                + 2 * K * tn * in_isz     # weight tile, double-buffered
                + 2 * tm * tn * out_isz   # output tile, double-buffered
                + tm * tn * 4)            # f32 matmul result
        if vmem <= _LINEAR_BUDGET:
            return tm, tn
    return tm, cands[-1]


def linear(x2d, w_t, b, *, out_dtype=None):
    """x2d: (M, K), w_t: (K, N) (already-transposed weight), b: (N,).

    K is not tiled: for GPT-2-scale C (K <= ~2304) a full-K tile fits VMEM,
    which removes the accumulator and makes both grid axes 'parallel'."""
    M, K = x2d.shape
    K2, N = w_t.shape
    assert K == K2
    if out_dtype is None:
        out_dtype = x2d.dtype

    tm, tn = _linear_tiles(M, K, N, x2d.dtype.itemsize,
                           jnp.dtype(out_dtype).itemsize)
    grid = (M // tm, N // tn)

    cost = pl.CostEstimate(
        flops=2 * M * N * K,
        transcendentals=0,
        bytes_accessed=(M * K * x2d.dtype.itemsize
                        + (M // tm) * K * N * w_t.dtype.itemsize
                        + M * N * jnp.dtype(out_dtype).itemsize
                        + N * b.dtype.itemsize),
    )

    return pl.pallas_call(
        _linear_kernel,
        out_shape=jax.ShapeDtypeStruct((M, N), out_dtype),
        grid=grid,
        in_specs=[
            pl.BlockSpec((tm, K), lambda i, j: (i, 0)),
            pl.BlockSpec((K, tn), lambda i, j: (0, j)),
            pl.BlockSpec((1, tn), lambda i, j: (0, j)),
        ],
        out_specs=pl.BlockSpec((tm, tn), lambda i, j: (i, j)),
        compiler_params=pltpu.CompilerParams(
            dimension_semantics=("parallel", "parallel"),
            vmem_limit_bytes=_VMEM_LIMIT,
        ),
        cost_estimate=cost,
    )(x2d, w_t, b.reshape(1, N))


# ----------------------------------------------------------------------------
# Kernel 2: attention with KV residency.  Grid = (B, T//tq); K/V blocks are
# full (T, C) and only change with the batch index (DMA'd once per batch
# element).  Heads are split into (H, ., hd) scratch and processed with one
# batched MXU einsum per matmul; output is stored lane-dense in (B, T, C).
# ----------------------------------------------------------------------------
def _attn_kernel(q_ref, k_ref, v_ref, o_ref, q3_sc, k3_sc, v3_sc, *, n_head):
    qi = pl.program_id(1)
    C = q_ref.shape[-1]
    hd = C // n_head

    # K/V stay VMEM-resident across q-tiles of the same batch element; split
    # them head-major ONCE per batch element (this per-iteration carry is why
    # the q-tile grid axis is marked "arbitrary").
    @pl.when(qi == 0)
    def _():
        for h in range(n_head):
            sl = slice(h * hd, (h + 1) * hd)
            k3_sc[h] = k_ref[0, :, sl]
            v3_sc[h] = v_ref[0, :, sl]

    for h in range(n_head):
        q3_sc[h] = q_ref[0, :, h * hd:(h + 1) * hd]

    q3 = q3_sc[...]        # (H, tq, hd) -- 1/sqrt(hd) already folded into W_q
    k3 = k3_sc[...]        # (H, T,  hd)
    v3 = v3_sc[...]        # (H, T,  hd)

    # One batched MXU pass (head = leading batch dim), f32 accumulation.
    s = jnp.einsum('hqd,hkd->hqk', q3, k3,
                   preferred_element_type=jnp.float32)       # (H, tq, T)

    # Reference's masked_fill(bias[:, :, T, T] == 0, -inf) indexes one scalar
    # (== 1 whenever T < block_size) and is a no-op, so there is no causal
    # mask: plain softmax over all T keys, exactly as the PyTorch forward.
    m = jnp.max(s, axis=-1, keepdims=True)
    p = jnp.exp(s - m)
    l = jnp.sum(p, axis=-1, keepdims=True)

    o = jnp.einsum('hqk,hkd->hqd', p.astype(v3.dtype), v3,
                   preferred_element_type=jnp.float32)       # (H, tq, hd)
    o = (o * pl.reciprocal(l, approx=True)).astype(o_ref.dtype)

    # Head merge = slice stores into the (1, tq, C) output VMEM block; the HBM
    # writeback remains a single lane-dense C-wide DMA per q-tile.
    for h in range(n_head):
        o_ref[0, :, h * hd:(h + 1) * hd] = o[h]


def attention_fused(qkv, n_head, *, tq=None):
    """qkv: (B, T, 3C) from c_attn; returns (B, T, C) attention output."""
    B, T, C3 = qkv.shape
    C = C3 // 3
    assert C * 3 == C3 and C % n_head == 0
    hd = C // n_head

    tq = tq or _pick(T, (128, 64, 32, 16, 8))
    grid = (B, T // tq)

    kernel = functools.partial(_attn_kernel, n_head=n_head)

    # q / k / v tiles are head-fused slices of the same qkv buffer: last-dim
    # block of width C at block index 0 / 1 / 2.  K/V use full-T blocks whose
    # index only depends on b -> resident across q-tiles.
    q_spec = pl.BlockSpec((1, tq, C), lambda b, qi: (b, qi, 0))
    k_spec = pl.BlockSpec((1, T, C), lambda b, qi: (b, 0, 1))
    v_spec = pl.BlockSpec((1, T, C), lambda b, qi: (b, 0, 2))
    o_spec = pl.BlockSpec((1, tq, C), lambda b, qi: (b, qi, 0))

    return pl.pallas_call(
        kernel,
        out_shape=jax.ShapeDtypeStruct((B, T, C), qkv.dtype),
        grid=grid,
        in_specs=[q_spec, k_spec, v_spec],
        out_specs=o_spec,
        scratch_shapes=[
            pltpu.VMEM((n_head, tq, hd), qkv.dtype),   # head-split q (per tile)
            pltpu.VMEM((n_head, T, hd), qkv.dtype),    # head-split k (per batch)
            pltpu.VMEM((n_head, T, hd), qkv.dtype),    # head-split v (per batch)
        ],
        compiler_params=pltpu.CompilerParams(
            # q-tile axis is "arbitrary" because the K/V head-split scratch is
            # reused across q-tiles of one batch element; batch stays parallel.
            dimension_semantics=("parallel", "arbitrary"),
            vmem_limit_bytes=_VMEM_LIMIT,
        ),
    )(qkv, qkv, qkv)


# ----------------------------------------------------------------------------
# Full module forward
# ----------------------------------------------------------------------------
def causal_self_attention(x, params, n_head, *, mxu_dtype=None):
    """x: (B, T, C). mxu_dtype=jnp.bfloat16 runs the matmuls with bf16 MXU
    operands (f32 accumulation, f32 softmax math) -- recommended on v5e/v6e/
    v7x; None keeps the input dtype everywhere."""
    B, T, C = x.shape
    assert C % n_head == 0
    hd = C // n_head

    # Fold the 1/sqrt(hd) attention scale into the Q third of c_attn, in f32,
    # before any bf16 cast (free; removes the per-step rescale in the kernel
    # and the bf16 rounding of the scale itself).
    scale = 1.0 / math.sqrt(hd)
    w_attn = params["w_attn_t"].at[:, :C].multiply(scale)
    b_attn = params["b_attn"].at[:C].multiply(scale)
    w_proj, b_proj = params["w_proj_t"], params["b_proj"]

    cdt = jnp.dtype(mxu_dtype) if mxu_dtype is not None else x.dtype
    if mxu_dtype is not None:
        x_in = x.astype(cdt)
        w_attn = w_attn.astype(cdt)
        w_proj = w_proj.astype(cdt)
    else:
        x_in = x

    # c_attn: (B*T, C) @ (C, 3C) + bias   (Q columns pre-scaled)
    qkv = linear(x_in.reshape(B * T, C), w_attn, b_attn, out_dtype=cdt)

    # Attention reads per-head q/k/v straight from qkv (no wrapper transposes)
    # and writes the merged-head output straight back in (B, T, C) layout.
    y = attention_fused(qkv.reshape(B, T, 3 * C), n_head)

    # c_proj
    y = linear(y.reshape(B * T, C), w_proj, b_proj, out_dtype=x.dtype)
    return y.reshape(B, T, C)


# ----------------------------------------------------------------------------
# Pure-JAX reference (mirrors the PyTorch forward) for a correctness check
# ----------------------------------------------------------------------------
def reference(x, params, n_head):
    B, T, C = x.shape
    hd = C // n_head
    qkv = x @ params["w_attn_t"] + params["b_attn"]
    q, k, v = jnp.split(qkv, 3, axis=2)
    q = q.reshape(B, T, n_head, hd).transpose(0, 2, 1, 3)
    k = k.reshape(B, T, n_head, hd).transpose(0, 2, 1, 3)
    v = v.reshape(B, T, n_head, hd).transpose(0, 2, 1, 3)
    att = (q @ k.transpose(0, 1, 3, 2)) * (1.0 / math.sqrt(hd))
    att = jax.nn.softmax(att, axis=-1)  # mask is a no-op in the reference
    y = att @ v
    y = y.transpose(0, 2, 1, 3).reshape(B, T, C)
    return y @ params["w_proj_t"] + params["b_proj"]


if __name__ == "__main__":
    # Small config consistent with the module: C % n_head == 0, T < block_size.
    # C is a multiple of 128 so blocks are lane-aligned.
    B, T, C, n_head = 2, 16, 128, 4

    key = jax.random.PRNGKey(0)
    k_x, k_wa, k_ba, k_wp, k_bp = jax.random.split(key, 5)

    # nn.Linear-style init: U(-1/sqrt(fan_in), 1/sqrt(fan_in)), weights stored
    # already transposed: (in_features, out_features).
    bound = 1.0 / math.sqrt(C)
    params = {
        "w_attn_t": jax.random.uniform(k_wa, (C, 3 * C), jnp.float32, -bound, bound),
        "b_attn":   jax.random.uniform(k_ba, (3 * C,),   jnp.float32, -bound, bound),
        "w_proj_t": jax.random.uniform(k_wp, (C, C),     jnp.float32, -bound, bound),
        "b_proj":   jax.random.uniform(k_bp, (C,),       jnp.float32, -bound, bound),
    }
    x = jax.random.normal(k_x, (B, T, C), jnp.float32)

    ref = reference(x, params, n_head)

    # f32 path (approx reciprocal -> slightly loosened tolerance).
    out = jax.block_until_ready(causal_self_attention(x, params, n_head))
    assert out.shape == (B, T, C)
    assert jnp.allclose(out, ref, atol=5e-3, rtol=5e-3), "f32 mismatch vs reference"

    # bf16-MXU-operand path (v5e/v6e/v7x), f32 accumulation / f32 softmax math.
    out_bf16 = jax.block_until_ready(
        causal_self_attention(x, params, n_head, mxu_dtype=jnp.bfloat16))
    assert out_bf16.shape == (B, T, C)
    assert bool(jnp.all(jnp.isfinite(out_bf16)))
    assert jnp.allclose(out_bf16, ref, atol=6e-2, rtol=6e-2), "bf16 mismatch vs reference"

    print("KERNEL_OK")
</pallas_src>

<mosaic_0001>
module attributes {stable_mosaic.version = 11 : i64} {
  func.func @_linear_kernel(%arg0: i32, %arg1: i32, %arg2: memref<32x128xf32, #tpu.memory_space<vmem>>, %arg3: memref<128x384xf32, #tpu.memory_space<vmem>>, %arg4: memref<1x384xf32, #tpu.memory_space<vmem>>, %arg5: memref<32x384xf32, #tpu.memory_space<vmem>>) attributes {dimension_semantics = [#tpu.dimension_semantics<parallel>, #tpu.dimension_semantics<parallel>], iteration_bounds = array<i64: 1, 1>, scalar_prefetch = 0 : i64, scratch_operands = 0 : i64, tpu.core_type = #tpu.core_type<tc>, window_params = [{transform_indices = @transform_0, window_bounds = array<i64: 32, 128>}, {transform_indices = @transform_1, window_bounds = array<i64: 128, 384>}, {transform_indices = @transform_2, window_bounds = array<i64: 1, 384>}, {transform_indices = @transform_3, window_bounds = array<i64: 32, 384>}]} {
    %c0 = arith.constant 0 : index
    %c0_0 = arith.constant 0 : index
    %0 = vector.load %arg2[%c0, %c0_0] : memref<32x128xf32, #tpu.memory_space<vmem>>, vector<32x128xf32>
    %c0_1 = arith.constant 0 : index
    %c0_2 = arith.constant 0 : index
    %1 = vector.load %arg3[%c0_1, %c0_2] : memref<128x384xf32, #tpu.memory_space<vmem>>, vector<128x384xf32>
    %cst = arith.constant dense<0.000000e+00> : vector<32x384xf32>
    %2 = tpu.matmul %0, %1, %cst {dimension_numbers = #tpu.dot_dimension_numbers<[1], [0], [0], [1], [0, 0, 1, 1], [], []>} : vector<32x128xf32>, vector<128x384xf32>, vector<32x384xf32> -> vector<32x384xf32>
    %c0_3 = arith.constant 0 : index
    %c0_4 = arith.constant 0 : index
    %3 = vector.load %arg4[%c0_3, %c0_4] : memref<1x384xf32, #tpu.memory_space<vmem>>, vector<1x384xf32>
    %4 = vector.broadcast %3 : vector<1x384xf32> to vector<32x384xf32>
    %5 = arith.addf %2, %4 : vector<32x384xf32>
    %c0_5 = arith.constant 0 : index
    %c0_6 = arith.constant 0 : index
    %6 = vector.load %arg5[%c0_5, %c0_6] : memref<32x384xf32, #tpu.memory_space<vmem>>, vector<32x384xf32>
    tpu.vector_store %arg5[%c0_5, %c0_6], %5 {strides = array<i32>} : memref<32x384xf32, #tpu.memory_space<vmem>>, vector<32x384xf32>,
    return
  }
  func.func @transform_0(%arg0: i32, %arg1: i32) -> (i32, i32) {
    %c0_i32 = arith.constant 0 : i32
    %c0_i32_0 = arith.constant 0 : i32
    return %arg0, %c0_i32 : i32, i32
  }
  func.func @transform_1(%arg0: i32, %arg1: i32) -> (i32, i32) {
    %c0_i32 = arith.constant 0 : i32
    %c0_i32_0 = arith.constant 0 : i32
    return %c0_i32, %arg1 : i32, i32
  }
  func.func @transform_2(%arg0: i32, %arg1: i32) -> (i32, i32) {
    %c0_i32 = arith.constant 0 : i32
    %c0_i32_0 = arith.constant 0 : i32
    return %c0_i32, %arg1 : i32, i32
  }
  func.func @transform_3(%arg0: i32, %arg1: i32) -> (i32, i32) {
    %c0_i32 = arith.constant 0 : i32
    return %arg0, %arg1 : i32, i32
  }
}

</mosaic_0001>

<bundles_post_ra>
// kernel: tpu_custom_call.1
= control target key start
LH: loop header
LB: loop body
LE: loop exit
PB: predicated region body
PF: predicated region fallthrough
CT: control target
= control target key end

     0   :  { %8 = vsyncpa [#allocation3], 0  ;;  %s411_s0 = inlined_call_operand.hbm [shape: f32[32,128], index: 0, kind: input, shape index: {}]   ;;  %s412_s1 = inlined_call_operand.hbm [shape: f32[128,384], index: 1, kind: input, shape index: {}]   ;;  %s413_s2 = inlined_call_operand.hbm [shape: f32[1,384], index: 2, kind: input, shape index: {}]   ;;  %s414_s3 = inlined_call_operand.hbm [shape: f32[32,384], index: 3, kind: output, shape index: {}]  }
   0x1   :  { %9 = vsyncpa [#allocation6], 0  ;;  %s28_s14 = sshll.u32 %s412_s1, 4  ;;  %s29_s14 = int_to_ptr.hbm [resolvable:$true] %s28_s14 }
   0x2   :  { %10 = vsyncpa [#allocation4], 0  ;;  %s365_s15 = smov [#allocation5]   ;;  %s15_s19 = sshll.u32 %s411_s0, 4  ;;  %s16_s19 = int_to_ptr.hbm [resolvable:$true] %s15_s19 }
   0x3   :  { %s30_s16 = sshll.u32 %s365_s15, 4  ;;  %s366_s20 = smov 384   ;;  %s31_s16 = int_to_ptr.vmem [resolvable:$true] %s30_s16 }
   0x4   :  { %s367_s21 = smov 24   ;;  %s368_s22 = smov [#allocation2]  }
   0x5   :  { %36 = dma.hbm_to_vmem [thread:$0]  %s29_s14, 6144, %s31_s16, [#allocation6], %s366_s20, %s366_s20, %s367_s21  }
   0x6   :  { %s17_s23 = sshll.u32 %s368_s22, 4  ;;  %s369_s1 = smov 128   ;;  %s18_s23 = int_to_ptr.vmem [resolvable:$true] %s17_s23 }
   0x7   :  { %s370_s24 = smov 8   ;;  %s42_s27 = sshll.u32 %s413_s2, 4  ;;  %s43_s27 = int_to_ptr.hbm [resolvable:$true] %s42_s27 }
   0x8   :  { %23 = dma.hbm_to_vmem [thread:$0]  %s16_s19, 512, %s18_s23, [#allocation3], %s369_s1, %s369_s1, %s370_s24  }
   0x9   :  { %s371_s28 = smov [#allocation7]  }
   0xa   :  { %s44_s0 = sshll.u32 %s371_s28, 4  ;;  %s45_s0 = int_to_ptr.vmem [resolvable:$true] %s44_s0 }
   0xb   :  { %47 = dma.hbm_to_vmem [thread:$0]  %s43_s27, 48, %s45_s0, [#allocation6]  }
   0xc   :  { %359 = dma.done.wait [#allocation3], 512  }
   0xd   :  { %360 = vsyncadd [#allocation3], 4294966784 }
   0xe   :  { %361 = dma.done.wait [#allocation6], 6192  }
   0xf   :  { %362 = vsyncadd [#allocation6], 4294961104  ;;  %v111_v0 = vld [vmem:[#allocation5 + $0x178] sm:$0xff]  ;;  %v108_v1 = vld [vmem:[#allocation5 + $0x160] sm:$0xff]  ;;  %s372_s2 = smov [#allocation8]   ;;  %s225_s5 = sshll.u32 %s414_s3, 4  ;;  %s226_s5 = int_to_ptr.hbm [resolvable:$true] %s225_s5 }
  0x10   :  { %178 = vmatpush.msra.mxu2 %v111_v0  ;;  %v110_v2 = vld [vmem:[#allocation5 + $0x170] sm:$0xff]  ;;  %v109_v3 = vld [vmem:[#allocation5 + $0x168] sm:$0xff]  ;;  %v107_v5 = vld [vmem:[#allocation5 + $0x158] sm:$0xff]  ;;  %s223_s29 = sshll.u32 %s372_s2, 4  ;;  %s224_s29 = int_to_ptr.vmem [resolvable:$true] %s223_s29 }
  0x11   :  { %v105_v4 = vld [vmem:[#allocation5 + $0x148] sm:$0xff]  ;;  %149 = vmatpush.msra.mxu1 %v110_v2  ;;  %239 = vmatpush.msra.mxu3 %v109_v3  ;;  %v106_v6 = vld [vmem:[#allocation5 + $0x150] sm:$0xff]  ;;  %v104_v7 = vld [vmem:[#allocation5 + $0x140] sm:$0xff] }
  0x12   :  { %179 = vmatpush.msra.mxu2 %v108_v1  ;;  %v103_v8 = vld [vmem:[#allocation5 + $0x138] sm:$0xff]  ;;  %120 = vmatpush.msra.mxu0 %v109_v3  ;;  %v102_v9 = vld [vmem:[#allocation5 + $0x130] sm:$0xff]  ;;  %v101_v10 = vld [vmem:[#allocation5 + $0x128] sm:$0xff] }
  0x13   :  { %150 = vmatpush.msra.mxu1 %v107_v5  ;;  %240 = vmatpush.msra.mxu3 %v106_v6  ;;  %v100_v11 = vld [vmem:[#allocation5 + $0x120] sm:$0xff]  ;;  %v99_v12 = vld [vmem:[#allocation5 + $0x118] sm:$0xff]  ;;  %v98_v13 = vld [vmem:[#allocation5 + $0x110] sm:$0xff] }
  0x14   :  { %180 = vmatpush.msra.mxu2 %v105_v4  ;;  %121 = vmatpush.msra.mxu0 %v106_v6  ;;  %v97_v14 = vld [vmem:[#allocation5 + $0x108] sm:$0xff]  ;;  %v96_v15 = vld [vmem:[#allocation5 + $0x100] sm:$0xff]  ;;  %v95_v16 = vld [vmem:[#allocation5 + $0xf8] sm:$0xff] }
  0x15   :  { %151 = vmatpush.msra.mxu1 %v104_v7  ;;  %241 = vmatpush.msra.mxu3 %v103_v8  ;;  %v94_v17 = vld [vmem:[#allocation5 + $0xf0] sm:$0xff]  ;;  %v93_v18 = vld [vmem:[#allocation5 + $0xe8] sm:$0xff]  ;;  %v92_v19 = vld [vmem:[#allocation5 + $0xe0] sm:$0xff] }
  0x16   :  { %181 = vmatpush.msra.mxu2 %v102_v9  ;;  %122 = vmatpush.msra.mxu0 %v103_v8  ;;  %v91_v20 = vld [vmem:[#allocation5 + $0xd8] sm:$0xff]  ;;  %v90_v21 = vld [vmem:[#allocation5 + $0xd0] sm:$0xff]  ;;  %v89_v22 = vld [vmem:[#allocation5 + $0xc8] sm:$0xff] }
  0x17   :  { %152 = vmatpush.msra.mxu1 %v101_v10  ;;  %242 = vmatpush.msra.mxu3 %v100_v11  ;;  %v88_v23 = vld [vmem:[#allocation5 + $0xc0] sm:$0xff]  ;;  %v87_v24 = vld [vmem:[#allocation5 + $0xb8] sm:$0xff]  ;;  %v86_v25 = vld [vmem:[#allocation5 + $0xb0] sm:$0xff] }
  0x18   :  { %182 = vmatpush.msra.mxu2 %v99_v12  ;;  %123 = vmatpush.msra.mxu0 %v100_v11  ;;  %v85_v26 = vld [vmem:[#allocation5 + $0xa8] sm:$0xff]  ;;  %v84_v27 = vld [vmem:[#allocation5 + $0xa0] sm:$0xff]  ;;  %v83_v28 = vld [vmem:[#allocation5 + $0x98] sm:$0xff] }
  0x19   :  { %153 = vmatpush.msra.mxu1 %v98_v13  ;;  %243 = vmatpush.msra.mxu3 %v97_v14  ;;  %v82_v29 = vld [vmem:[#allocation5 + $0x90] sm:$0xff]  ;;  %v81_v30 = vld [vmem:[#allocation5 + $0x88] sm:$0xff]  ;;  %v80_v31 = vld [vmem:[#allocation5 + $0x80] sm:$0xff] }
  0x1a   :  { %183 = vmatpush.msra.mxu2 %v96_v15  ;;  %124 = vmatpush.msra.mxu0 %v97_v14  ;;  %v79_v32 = vld [vmem:[#allocation5 + $0x78] sm:$0xff]  ;;  %v78_v33 = vld [vmem:[#allocation5 + $0x70] sm:$0xff]  ;;  %v77_v34 = vld [vmem:[#allocation5 + $0x68] sm:$0xff] }
  0x1b   :  { %154 = vmatpush.msra.mxu1 %v95_v16  ;;  %244 = vmatpush.msra.mxu3 %v94_v17  ;;  %v76_v35 = vld [vmem:[#allocation5 + $0x60] sm:$0xff]  ;;  %v75_v36 = vld [vmem:[#allocation5 + $0x58] sm:$0xff]  ;;  %v74_v37 = vld [vmem:[#allocation5 + $0x50] sm:$0xff] }
  0x1c   :  { %184 = vmatpush.msra.mxu2 %v93_v18  ;;  %125 = vmatpush.msra.mxu0 %v94_v17  ;;  %v73_v38 = vld [vmem:[#allocation5 + $0x48] sm:$0xff]  ;;  %v72_v39 = vld [vmem:[#allocation5 + $0x40] sm:$0xff]  ;;  %v71_v40 = vld [vmem:[#allocation5 + $0x38] sm:$0xff] }
  0x1d   :  { %155 = vmatpush.msra.mxu1 %v92_v19  ;;  %245 = vmatpush.msra.mxu3 %v91_v20  ;;  %v70_v41 = vld [vmem:[#allocation5 + $0x30] sm:$0xff]  ;;  %v69_v42 = vld [vmem:[#allocation5 + $0x28] sm:$0xff]  ;;  %v68_v43 = vld [vmem:[#allocation5 + $0x20] sm:$0xff] }
  0x1e   :  { %185 = vmatpush.msra.mxu2 %v90_v21  ;;  %126 = vmatpush.msra.mxu0 %v91_v20  ;;  %v67_v44 = vld [vmem:[#allocation5 + $0x18] sm:$0xff]  ;;  %v66_v45 = vld [vmem:[#allocation5 + $0x10] sm:$0xff]  ;;  %v60_v46 = vld [vmem:[#allocation2] sm:$0xff] }
  0x1f   :  { %156 = vmatpush.msra.mxu1 %v89_v22  ;;  %246 = vmatpush.msra.mxu3 %v88_v23  ;;  %v65_v47 = vld [vmem:[#allocation5 + $0x8] sm:$0xff]  ;;  %v64_v48 = vld [vmem:[#allocation5] sm:$0xff]  ;;  %v62_v50 = vld [vmem:[#allocation2 + $0x10] sm:$0xff] }
  0x20   :  { %186 = vmatpush.msra.mxu2 %v87_v24  ;;  %127 = vmatpush.msra.mxu0 %v88_v23  ;;  %v61_v49 = vld [vmem:[#allocation2 + $0x8] sm:$0xff]  ;;  %v63_v51 = vld [vmem:[#allocation2 + $0x18] sm:$0xff]  ;;  %v112_v52 = vld [vmem:[#allocation7] sm:$0x7] }
  0x21   :  { %157 = vmatpush.msra.mxu1 %v86_v25  ;;  %247 = vmatpush.msra.mxu3 %v85_v26  ;;  %v115_v53 = vperm.slane %v112_v52, 1  ;;  %v114_v56 = vperm.slane %v112_v52, 0  ;;  %v116_v57 = vperm.slane %v112_v52, 2 }
  0x22   :  { %187 = vmatpush.msra.mxu2 %v84_v27  ;;  %128 = vmatpush.msra.mxu0 %v85_v26 }
  0x23   :  { %158 = vmatpush.msra.mxu1 %v83_v28  ;;  %248 = vmatpush.msra.mxu3 %v82_v29 }
  0x24   :  { %188 = vmatpush.msra.mxu2 %v81_v30  ;;  %129 = vmatpush.msra.mxu0 %v82_v29 }
  0x25   :  { %159 = vmatpush.msra.mxu1 %v80_v31  ;;  %249 = vmatpush.msra.mxu3 %v79_v32 }
  0x26   :  { %189 = vmatpush.msra.mxu2 %v78_v33  ;;  %130 = vmatpush.msra.mxu0 %v79_v32 }
  0x27   :  { %160 = vmatpush.msra.mxu1 %v77_v34  ;;  %250 = vmatpush.msra.mxu3 %v76_v35 }
  0x28   :  { %190 = vmatpush.msra.mxu2 %v75_v36  ;;  %131 = vmatpush.msra.mxu0 %v76_v35 }
  0x29   :  { %161 = vmatpush.msra.mxu1 %v74_v37  ;;  %251 = vmatpush.msra.mxu3 %v73_v38 }
  0x2a   :  { %191 = vmatpush.msra.mxu2 %v72_v39  ;;  %132 = vmatpush.msra.mxu0 %v73_v38 }
  0x2b   :  { %162 = vmatpush.msra.mxu1 %v71_v40  ;;  %252 = vmatpush.msra.mxu3 %v70_v41 }
  0x2c   :  { %192 = vmatpush.msra.mxu2 %v69_v42  ;;  %133 = vmatpush.msra.mxu0 %v70_v41 }
  0x2d   :  { %163 = vmatpush.msra.mxu1 %v68_v43  ;;  %253 = vmatpush.msra.mxu3 %v67_v44 }
  0x2e   :  { %193 = vmatpush.msra.mxu2 %v66_v45  ;;  %134 = vmatpush.msra.mxu0 %v67_v44 }
  0x2f   :  { %194 = vmatmul.f32.vlgmr.msra.gmra.mxu2 %v60_v46  ;;  %164 = vmatpush.msra.mxu1 %v65_v47 }
  0x30   :  { %165 = vmatmul.f32.vlgmr.msra.gmra.mxu1 %v60_v46  ;;  %254 = vmatpush.msra.mxu3 %v64_v48 }
  0x31   :  { %139 = vmatmul.f32.vlgmr.msra.gmra.mxu3 %v61_v49  ;;  %135 = vmatpush.msra.mxu0 %v64_v48 }
  0x32   :  { %136 = vmatmul.f32.vlgmr.msra.gmra.mxu0 %v60_v46 }
  0x37   :  { %197 = vmatmul.f32.gmra.mxu2 %v61_v49 }
  0x38   :  { %168 = vmatmul.f32.gmra.mxu1 %v61_v49 }
  0x39   :  { %142 = vmatmul.f32.gmra.mxu3 %v62_v50 }
  0x3f   :  { %200 = vmatmul.f32.gmra.mxu2 %v62_v50 }
  0x40   :  { %171 = vmatmul.f32.gmra.mxu1 %v62_v50 }
  0x41   :  { %145 = vmatmul.f32.gmra.mxu3 %v63_v51 }
  0x47   :  { %203 = vmatmul.f32.gmra.mxu2 %v63_v51 }
  0x48   :  { %174 = vmatmul.f32.gmra.mxu1 %v63_v51 }
  0xad   :  { %v166_v54 = vpop.f32.mrf.mxu1 }
  0xae   :  { %v167_v55 = vadd.f32 %v166_v54, %v115_v53 }
  0xaf   :  { %v137_v58 = vpop.f32.mrf.mxu0 }
  0xb0   :  { %208 = vst [vmem:[#allocation8 + $0x8] sm:$0xff] %v167_v55  ;;  %v138_v59 = vadd.f32 %v137_v58, %v114_v56 }
  0xb2   :  { %v195_v60 = vpop.f32.mrf.mxu2  ;;  %207 = vst [vmem:[#allocation8] sm:$0xff] %v138_v59 }
  0xb3   :  { %v196_v61 = vadd.f32 %v195_v60, %v116_v57 }
  0xb4   :  { %v140_v62 = vpop.f32.mrf.mxu3 }
  0xb5   :  { %209 = vst [vmem:[#allocation8 + $0x10] sm:$0xff] %v196_v61  ;;  %v141_v63 = vadd.f32 %v140_v62, %v114_v56  ;;  %v169_v0 = vpop.f32.mrf.mxu1 }
  0xb6   :  { %v170_v1 = vadd.f32 %v169_v0, %v115_v53 }
  0xb7   :  { %210 = vst [vmem:[#allocation8 + $0x18] sm:$0xff] %v141_v63 }
  0xb8   :  { %211 = vst [vmem:[#allocation8 + $0x20] sm:$0xff] %v170_v1 }
  0xba   :  { %v198_v2 = vpop.f32.mrf.mxu2 }
  0xbb   :  { %v199_v3 = vadd.f32 %v198_v2, %v116_v57 }
  0xbc   :  { %v143_v4 = vpop.f32.mrf.mxu3 }
  0xbd   :  { %212 = vst [vmem:[#allocation8 + $0x28] sm:$0xff] %v199_v3  ;;  %v144_v5 = vadd.f32 %v143_v4, %v114_v56  ;;  %v172_v6 = vpop.f32.mrf.mxu1 }
  0xbe   :  { %v173_v7 = vadd.f32 %v172_v6, %v115_v53 }
  0xbf   :  { %213 = vst [vmem:[#allocation8 + $0x30] sm:$0xff] %v144_v5 }
  0xc0   :  { %214 = vst [vmem:[#allocation8 + $0x38] sm:$0xff] %v173_v7 }
  0xc2   :  { %v201_v8 = vpop.f32.mrf.mxu2 }
  0xc3   :  { %v202_v9 = vadd.f32 %v201_v8, %v116_v57 }
  0xc4   :  { %v146_v10 = vpop.f32.mrf.mxu3 }
  0xc5   :  { %215 = vst [vmem:[#allocation8 + $0x40] sm:$0xff] %v202_v9  ;;  %v147_v11 = vadd.f32 %v146_v10, %v114_v56  ;;  %v175_v12 = vpop.f32.mrf.mxu1 }
  0xc6   :  { %v176_v13 = vadd.f32 %v175_v12, %v115_v53 }
  0xc7   :  { %216 = vst [vmem:[#allocation8 + $0x48] sm:$0xff] %v147_v11 }
  0xc8   :  { %217 = vst [vmem:[#allocation8 + $0x50] sm:$0xff] %v176_v13 }
  0xca   :  { %v204_v14 = vpop.f32.mrf.mxu2 }
  0xcb   :  { %v205_v15 = vadd.f32 %v204_v14, %v116_v57 }
  0xcd   :  { %218 = vst [vmem:[#allocation8 + $0x58] sm:$0xff] %v205_v15 }
  0xce   :  { %231 = dma.vmem_to_hbm [thread:$0]  %s224_s29, 1536, %s226_s5, [#allocation4], %s366_s20, %s366_s20, %s367_s21  }
  0xcf   :  { %363 = dma.done.wait [#allocation4], 1536  }
  0xd0   :  { %364 = vsyncadd [#allocation4], 4294965760 }
  0xd1   :  { %236 = vsyncpa [#allocation3], 1 }
  0xd2   :  { %237 = vsyncpa [#allocation6], 1 }
  0xd3   :  { %238 = vsyncpa [#allocation4], 1 }

</bundles_post_ra>
